<compile_context>
chip_gen: v5e
topology: v5e:2x2
jax: 0.10.0
libtpu: 0.0.40
codegen_flags: <defaults>
</compile_context>

<pallas_src>
import jax
import jax.numpy as jnp
from jax.experimental import pallas as pl
from jax.experimental.pallas import tpu as pltpu


def pairwise_dist_kernel(ccol_ref, crow_ref, dist_ref):
    # ccol_ref: (TB, 2, N_col)   column coords [x; y], lane-dense along N_col
    # crow_ref: (TB, TM, 2)      row coords for this row tile
    # dist_ref: (TB, TM, N_col)  d[b, i, j] = || c_i - c_j ||
    xr = ccol_ref[:, 0:1, :]          # (TB, 1, N_col)  x_j along lanes
    yr = ccol_ref[:, 1:2, :]          # (TB, 1, N_col)
    xc = crow_ref[:, :, 0:1]          # (TB, TM, 1)     x_i along sublanes
    yc = crow_ref[:, :, 1:2]          # (TB, TM, 1)

    # Pure VPU broadcast-subtract; sqrt rides the (idle) EUP slot.
    dx = xc - xr                      # (TB, TM, N_col)
    dy = yc - yr
    dist_ref[...] = jnp.sqrt(dx * dx + dy * dy).astype(dist_ref.dtype)


def _round_up(x, m):
    return ((x + m - 1) // m) * m


def _choose_tiles(B, n_row, n_col, elem_bytes, target_out_bytes=8 << 20):
    """Pick (TB, TM) so one dist output block is ~target_out_bytes."""
    full_row_bytes = n_row * n_col * elem_bytes        # one batch, all rows
    if full_row_bytes <= target_out_bytes:
        tm = n_row
        tb = max(1, min(B, target_out_bytes // max(full_row_bytes, 1)))
    else:
        tb = 1
        tm = max(8, (target_out_bytes // (n_col * elem_bytes)) // 8 * 8)
        tm = min(tm, n_row)
    return int(tb), int(tm)


def ground_truth_forward(coords, tour, dist_dtype=jnp.float32):
    """coords: (B, N, 2) float32 node coordinates,
    tour:   (B, N)   int32 permutation per batch (closed tour).

    Returns (dist_matrix (B, N, N) dist_dtype, tour_cost (B, 1) float32).
    """
    coords = coords.astype(jnp.float32)
    B, N, _ = coords.shape

    # ---- Tour cost: O(B*N) glue math in plain JAX (per perf review) ----
    ct = jnp.take_along_axis(coords, tour[..., None].astype(jnp.int32), axis=1)
    seg = jnp.roll(ct, -1, axis=1) - ct
    cost = jnp.sum(jnp.sqrt(jnp.sum(seg * seg, axis=-1)), axis=1, keepdims=True)

    # ---- Pairwise distance matrix via Pallas ----
    elem = jnp.dtype(dist_dtype).itemsize
    n_col = _round_up(N, 128)                 # lane-dense output stores
    n_row = _round_up(N, 8)                   # sublane alignment
    TB, TM = _choose_tiles(B, n_row, n_col, elem)
    n_row = _round_up(n_row, TM)              # TM divides the (padded) row dim
    b_pad = _round_up(B, TB)                  # TB divides the (padded) batch

    x = coords[..., 0]
    y = coords[..., 1]
    # Column coords, lane-dense: (B_pad, 2, N_col) with rows [x; y].
    ccol = jnp.zeros((b_pad, 2, n_col), jnp.float32)
    ccol = ccol.at[:B, 0, :N].set(x).at[:B, 1, :N].set(y)
    # Row coords: (B_pad, N_row, 2).  Last-dim-2 tile lane-pads in VMEM but is
    # tiny (TB*TM*128*4 B per buffer).
    crow = jnp.zeros((b_pad, n_row, 2), jnp.float32)
    crow = crow.at[:B, :N, :].set(coords)

    grid = (b_pad // TB, n_row // TM)

    # Per-step VMEM footprint (double-buffered), used to size the scoped VMEM
    # limit explicitly (v5e default is only ~16 MiB).
    vmem_bytes = 2 * (
        TB * TM * n_col * elem        # dist output block
        + TB * 8 * n_col * 4          # ccol block (sublane-padded 2->8)
        + TB * TM * 128 * 4           # crow block (lane-padded 2->128)
    )
    vmem_limit = int(max(32 << 20, vmem_bytes + (4 << 20)))

    dist_padded = pl.pallas_call(
        pairwise_dist_kernel,
        out_shape=jax.ShapeDtypeStruct((b_pad, n_row, n_col), dist_dtype),
        grid_spec=pltpu.PrefetchScalarGridSpec(
            num_scalar_prefetch=0,
            grid=grid,
            in_specs=[
                pl.BlockSpec((TB, 2, n_col), lambda b, i: (b, 0, 0)),
                pl.BlockSpec((TB, TM, 2), lambda b, i: (b, i, 0)),
            ],
            out_specs=pl.BlockSpec((TB, TM, n_col), lambda b, i: (b, i, 0)),
        ),
        compiler_params=pltpu.CompilerParams(
            dimension_semantics=("parallel", "parallel"),
            vmem_limit_bytes=vmem_limit,
        ),
    )(ccol, crow)

    dist = dist_padded[:B, :N, :N]
    return dist, cost


def _reference(coords, tour):
    diff = coords[:, :, None, :] - coords[:, None, :, :]
    dist = jnp.sqrt(jnp.sum(diff * diff, axis=-1))
    nxt = jnp.roll(tour, -1, axis=1)
    cost = jnp.sum(
        jnp.take_along_axis(
            jnp.take_along_axis(dist, tour[:, :, None], axis=1),
            nxt[:, :, None], axis=2)[:, :, 0],
        axis=1, keepdims=True)
    return dist, cost


if __name__ == "__main__":
    key = jax.random.PRNGKey(0)
    B, N = 2, 16
    k_coords, k_perm = jax.random.split(key)
    coords = jax.random.uniform(k_coords, (B, N, 2), dtype=jnp.float32)
    # Deterministic per-batch tours (permutations of the N nodes).
    tours = jnp.stack([
        jax.random.permutation(jax.random.fold_in(k_perm, b), N)
        for b in range(B)
    ]).astype(jnp.int32)

    dist, cost = ground_truth_forward(coords, tours)
    jax.block_until_ready((dist, cost))

    ref_dist, ref_cost = _reference(coords, tours)
    assert dist.shape == (B, N, N) and cost.shape == (B, 1)
    assert jnp.allclose(dist, ref_dist, atol=1e-5), "dist mismatch"
    assert jnp.allclose(cost, ref_cost, atol=1e-4), "cost mismatch"

    print("KERNEL_OK")
</pallas_src>

<mosaic_0001>
module attributes {stable_mosaic.version = 11 : i64} {
  func.func @pairwise_dist_kernel(%arg0: i32, %arg1: i32, %arg2: memref<2x2x128xf32, #tpu.memory_space<vmem>>, %arg3: memref<2x16x2xf32, #tpu.memory_space<vmem>>, %arg4: memref<2x16x128xf32, #tpu.memory_space<vmem>>) attributes {dimension_semantics = [#tpu.dimension_semantics<parallel>, #tpu.dimension_semantics<parallel>], iteration_bounds = array<i64: 1, 1>, scalar_prefetch = 0 : i64, scratch_operands = 0 : i64, tpu.core_type = #tpu.core_type<tc>, window_params = [{transform_indices = @transform_0, window_bounds = array<i64: 2, 2, 128>}, {transform_indices = @transform_1, window_bounds = array<i64: 2, 16, 2>}, {transform_indices = @transform_2, window_bounds = array<i64: 2, 16, 128>}]} {
    %c0 = arith.constant 0 : index
    %c0_0 = arith.constant 0 : index
    %c0_1 = arith.constant 0 : index
    %0 = vector.load %arg2[%c0, %c0_0, %c0_1] : memref<2x2x128xf32, #tpu.memory_space<vmem>>, vector<2x1x128xf32>
    %c0_2 = arith.constant 0 : index
    %c1 = arith.constant 1 : index
    %c0_3 = arith.constant 0 : index
    %1 = vector.load %arg2[%c0_2, %c1, %c0_3] : memref<2x2x128xf32, #tpu.memory_space<vmem>>, vector<2x1x128xf32>
    %c0_4 = arith.constant 0 : index
    %c0_5 = arith.constant 0 : index
    %c0_6 = arith.constant 0 : index
    %2 = vector.load %arg3[%c0_4, %c0_5, %c0_6] : memref<2x16x2xf32, #tpu.memory_space<vmem>>, vector<2x16x1xf32>
    %c0_7 = arith.constant 0 : index
    %c0_8 = arith.constant 0 : index
    %c1_9 = arith.constant 1 : index
    %3 = vector.load %arg3[%c0_7, %c0_8, %c1_9] : memref<2x16x2xf32, #tpu.memory_space<vmem>>, vector<2x16x1xf32>
    %4 = vector.broadcast %2 : vector<2x16x1xf32> to vector<2x16x128xf32>
    %5 = vector.broadcast %0 : vector<2x1x128xf32> to vector<2x16x128xf32>
    %6 = arith.subf %4, %5 : vector<2x16x128xf32>
    %7 = vector.broadcast %3 : vector<2x16x1xf32> to vector<2x16x128xf32>
    %8 = vector.broadcast %1 : vector<2x1x128xf32> to vector<2x16x128xf32>
    %9 = arith.subf %7, %8 : vector<2x16x128xf32>
    %10 = arith.mulf %6, %6 : vector<2x16x128xf32>
    %11 = arith.mulf %9, %9 : vector<2x16x128xf32>
    %12 = arith.addf %10, %11 : vector<2x16x128xf32>
    %13 = math.sqrt %12 : vector<2x16x128xf32>
    %c0_10 = arith.constant 0 : index
    %c0_11 = arith.constant 0 : index
    %c0_12 = arith.constant 0 : index
    %14 = vector.load %arg4[%c0_10, %c0_11, %c0_12] : memref<2x16x128xf32, #tpu.memory_space<vmem>>, vector<2x16x128xf32>
    tpu.vector_store %arg4[%c0_10, %c0_11, %c0_12], %13 {strides = array<i32>} : memref<2x16x128xf32, #tpu.memory_space<vmem>>, vector<2x16x128xf32>,
    return
  }
  func.func @transform_0(%arg0: i32, %arg1: i32) -> (i32, i32, i32) {
    %c0_i32 = arith.constant 0 : i32
    %c0_i32_0 = arith.constant 0 : i32
    %c0_i32_1 = arith.constant 0 : i32
    return %arg0, %c0_i32, %c0_i32_0 : i32, i32, i32
  }
  func.func @transform_1(%arg0: i32, %arg1: i32) -> (i32, i32, i32) {
    %c0_i32 = arith.constant 0 : i32
    %c0_i32_0 = arith.constant 0 : i32
    return %arg0, %arg1, %c0_i32 : i32, i32, i32
  }
  func.func @transform_2(%arg0: i32, %arg1: i32) -> (i32, i32, i32) {
    %c0_i32 = arith.constant 0 : i32
    %c0_i32_0 = arith.constant 0 : i32
    return %arg0, %arg1, %c0_i32 : i32, i32, i32
  }
}

</mosaic_0001>

<bundles_post_ra>
// kernel: tpu_custom_call.1
= control target key start
LH: loop header
LB: loop body
LE: loop exit
PB: predicated region body
PF: predicated region fallthrough
CT: control target
= control target key end

     0   :  { %v198_v2 = vmov 0   ;;  %s245_s0 = inlined_call_operand.vmem [shape: f32[2,2,128], index: 0, kind: input, shape index: {}]   ;;  %s246_s1 = inlined_call_operand.vmem [shape: f32[2,16,2], index: 1, kind: input, shape index: {}]   ;;  %s247_s2 = inlined_call_operand.hbm [shape: f32[2,16,128], index: 2, kind: output, shape index: {}]  }
   0x1   :  { %v18_v0 = vld [vmem:[%s246_s1 + $0x10] sm:$0xff]  ;;  %v16_v1 = vld [vmem:[%s246_s1] sm:$0xff]  ;;  %156 = vset.pattern.permute.xlu1 %v198_v2  ;;  %155 = vset.pattern.permute.xlu0 %v198_v2 }
   0x2   :  { %32 = vperm.xlu1 %156, %v18_v0   ;;  %22 = vperm.xlu0 %155, %v16_v1  }
   0x3   :  { %7 = vsyncpa [#allocation3], 0  ;;  %v199_v3 = vmov 1   ;;  %v19_v4 = vld [vmem:[%s246_s1 + $0x18] sm:$0xff]  ;;  %v17_v5 = vld [vmem:[%s246_s1 + $0x8] sm:$0xff]  ;;  %s138_s27 = sshll.u32 %s247_s2, 4  ;;  %s139_s27 = int_to_ptr.hbm [resolvable:$true] %s138_s27 }
   0x4   :  { %157 = vset.pattern.permute.xlu2 %v199_v3  ;;  %v161_v7 = vld [vmem:[%s245_s0 + $0x1] ss:$0 sm:$0xff]  ;;  %v162_v9 = vld [vmem:[%s245_s0] ss:$0 sm:$0xff]  ;;  %v160_v22 = vld [vmem:[%s245_s0 + $0x2] ss:$0 sm:$0xff] }
   0x5   :  { %47 = vperm.xlu2 %157, %v16_v1   ;;  %v163_v27 = vld [vmem:[%s245_s0 + $0x3] ss:$0 sm:$0xff]  ;;  %s200_s0 = smov [#allocation2]   ;;  %s201_s28 = smov 128  }
   0x6   :  { %s136_s24 = sshll.u32 %s200_s0, 4  ;;  %s202_s29 = smov 8   ;;  %s137_s24 = int_to_ptr.vmem [resolvable:$true] %s136_s24 }
   0xa   :  { %37 = vperm.xlu1 %156, %v19_v4   ;;  %27 = vperm.xlu0 %155, %v17_v5  }
   0xd   :  { %51 = vperm.xlu2 %157, %v17_v5  }
  0x12   :  { %159 = vset.pattern.permute.xlu1 %v199_v3  ;;  %158 = vset.pattern.permute.xlu0 %v199_v3 }
  0x13   :  { %59 = vperm.xlu1 %159, %v19_v4   ;;  %55 = vperm.xlu0 %158, %v18_v0  }
  0x5f   :  { %v48_v6 = vpop.permute.xlu2 %47 }
  0x60   :  { %v64_v8 = vsub.f32 %v48_v6, %v161_v7 }
  0x62   :  { %v72_v12 = vmul.f32 %v64_v8, %v64_v8 }
  0x67   :  { %v52_v14 = vpop.permute.xlu2 %51 }
  0x68   :  { %v65_v17 = vsub.f32 %v52_v14, %v161_v7 }
  0x6a   :  { %v73_v20 = vmul.f32 %v65_v17, %v65_v17 }
  0x74   :  { %v33_v10 = vpop.permute.xlu1 %32  ;;  %v23_v11 = vpop.permute.xlu0 %22 }
  0x75   :  { %v42_v13 = vsub.f32 %v23_v11, %v162_v9  ;;  %v44_v28 = vsub.f32 %v33_v10, %v160_v22 }
  0x77   :  { %v68_v15 = vmul.f32 %v42_v13, %v42_v13  ;;  %v70_v36 = vmul.f32 %v44_v28, %v44_v28 }
  0x79   :  { %v76_v16 = vadd.f32 %v72_v12, %v68_v15 }
  0x7b   :  { %164 = vrsqrt.f32 %v76_v16  ;;  %vm87_vm0 = vcmp.eq.f32.partialorder %v76_v16, inf  ;;  %v90_v48 = vand.u32 2147483648, %v76_v16  ;;  %vm89_vm1 = vcmp.eq.f32.partialorder %v76_v16, 0.0 }
  0x7c   :  { %v38_v18 = vpop.permute.xlu1 %37  ;;  %v28_v19 = vpop.permute.xlu0 %27 }
  0x7d   :  { %v43_v21 = vsub.f32 %v28_v19, %v162_v9  ;;  %v45_v30 = vsub.f32 %v38_v18, %v160_v22 }
  0x7f   :  { %v69_v23 = vmul.f32 %v43_v21, %v43_v21  ;;  %v71_v38 = vmul.f32 %v45_v30, %v45_v30 }
  0x81   :  { %v165_v24 = vpop.eup %164  ;;  %v77_v25 = vadd.f32 %v73_v20, %v69_v23 }
  0x82   :  { %v81_v26 = vmul.f32 %v165_v24, %v76_v16 }
  0x83   :  { %166 = vrsqrt.f32 %v77_v25  ;;  %vm99_vm2 = vcmp.eq.f32.partialorder %v77_v25, inf  ;;  %v102_v60 = vand.u32 2147483648, %v77_v25  ;;  %vm101_vm3 = vcmp.eq.f32.partialorder %v77_v25, 0.0 }
  0x84   :  { %v82_v29 = vmul.f32 %v165_v24, %v81_v26 }
  0x85   :  { %v60_v31 = vpop.permute.xlu1 %59  ;;  %v56_v32 = vpop.permute.xlu0 %55 }
  0x86   :  { %v83_v33 = vmul.f32 0.5, %v82_v29  ;;  %v67_v34 = vsub.f32 %v60_v31, %v163_v27  ;;  %v66_v35 = vsub.f32 %v56_v32, %v163_v27 }
  0x88   :  { %v84_v37 = vsub.f32 1.5, %v83_v33  ;;  %v75_v39 = vmul.f32 %v67_v34, %v67_v34  ;;  %v74_v40 = vmul.f32 %v66_v35, %v66_v35 }
  0x89   :  { %v167_v41 = vpop.eup %166 }
  0x8a   :  { %v93_v42 = vmul.f32 %v167_v41, %v77_v25  ;;  %v79_v43 = vadd.f32 %v75_v39, %v71_v38  ;;  %v78_v44 = vadd.f32 %v74_v40, %v70_v36  ;;  %v85_v45 = vmul.f32 %v165_v24, %v84_v37 }
  0x8c   :  { %v94_v46 = vmul.f32 %v167_v41, %v93_v42  ;;  %168 = vrsqrt.f32 %v79_v43  ;;  %v86_v47 = vmul.f32 %v85_v45, %v76_v16  ;;  %vm123_vm4 = vcmp.eq.f32.partialorder %v79_v43, inf }
  0x8d   :  { %170 = vrsqrt.f32 %v78_v44  ;;  %v126_v8 = vand.u32 2147483648, %v79_v43  ;;  %vm111_vm5 = vcmp.eq.f32.partialorder %v78_v44, inf  ;;  %v114_v9 = vand.u32 2147483648, %v78_v44 }
  0x8e   :  { %v95_v49 = vmul.f32 0.5, %v94_v46  ;;  %v88_v50 = vsel %vm87_vm0, %v76_v16, %v86_v47  ;;  %vm125_vm6 = vcmp.eq.f32.partialorder %v79_v43, 0.0  ;;  %vm113_vm7 = vcmp.eq.f32.partialorder %v78_v44, 0.0 }
  0x8f   :  { %v91_v51 = vsel %vm89_vm1, %v90_v48, %v88_v50 }
  0x90   :  { %v96_v52 = vsub.f32 1.5, %v95_v49  ;;  %128 = vst [vmem:[#allocation2] sm:$0xff] %v91_v51 }
  0x92   :  { %v169_v53 = vpop.eup %168  ;;  %v97_v54 = vmul.f32 %v167_v41, %v96_v52 }
  0x93   :  { %v171_v55 = vpop.eup %170  ;;  %v117_v56 = vmul.f32 %v169_v53, %v79_v43 }
  0x94   :  { %v105_v57 = vmul.f32 %v171_v55, %v78_v44  ;;  %v98_v58 = vmul.f32 %v97_v54, %v77_v25 }
  0x95   :  { %v118_v59 = vmul.f32 %v169_v53, %v117_v56 }
  0x96   :  { %v106_v61 = vmul.f32 %v171_v55, %v105_v57  ;;  %v100_v62 = vsel %vm99_vm2, %v77_v25, %v98_v58 }
  0x97   :  { %v119_v63 = vmul.f32 0.5, %v118_v59  ;;  %v103_v0 = vsel %vm101_vm3, %v102_v60, %v100_v62 }
  0x98   :  { %v107_v1 = vmul.f32 0.5, %v106_v61  ;;  %129 = vst [vmem:[#allocation2 + $0x8] sm:$0xff] %v103_v0 }
  0x99   :  { %v120_v2 = vsub.f32 1.5, %v119_v63 }
  0x9a   :  { %v108_v3 = vsub.f32 1.5, %v107_v1 }
  0x9b   :  { %v121_v4 = vmul.f32 %v169_v53, %v120_v2 }
  0x9c   :  { %v109_v5 = vmul.f32 %v171_v55, %v108_v3 }
  0x9d   :  { %v122_v6 = vmul.f32 %v121_v4, %v79_v43 }
  0x9e   :  { %v110_v7 = vmul.f32 %v109_v5, %v78_v44 }
  0x9f   :  { %v124_v10 = vsel %vm123_vm4, %v79_v43, %v122_v6 }
  0xa0   :  { %v112_v11 = vsel %vm111_vm5, %v78_v44, %v110_v7  ;;  %v127_v12 = vsel %vm125_vm6, %v126_v8, %v124_v10 }
  0xa1   :  { %v115_v13 = vsel %vm113_vm7, %v114_v9, %v112_v11  ;;  %131 = vst [vmem:[#allocation2 + $0x18] sm:$0xff] %v127_v12 }
  0xa2   :  { %130 = vst [vmem:[#allocation2 + $0x10] sm:$0xff] %v115_v13 }
  0xa3   :  { %144 = dma.vmem_to_hbm [thread:$0]  %s137_s24, 512, %s139_s27, [#allocation3], %s201_s28, %s201_s28, %s202_s29  }
  0xa4   :  { %196 = dma.done.wait [#allocation3], 512  }
  0xa5   :  { %197 = vsyncadd [#allocation3], 4294966784 }
  0xa6   :  { %149 = vsyncpa [#allocation3], 1 }

</bundles_post_ra>
